<compile_context>
chip_gen: v5e
topology: v5e:2x2
jax: 0.10.0
libtpu: 0.0.40
codegen_flags: <defaults>
</compile_context>

<pallas_src>
import functools

import jax
import jax.numpy as jnp
from jax.experimental import pallas as pl
from jax.experimental.pallas import tpu as pltpu

_SUBLANE = 8            # f32 sublane tiling
_LANE_WIDTH = 128       # lane-dense slab width (one full vreg of lanes)
_TARGET_BLOCK_ROWS = 4096  # 4096 x 128 x 4 B = 2 MiB f32 per block


def _round_up(n, m):
    return ((n + m - 1) // m) * m


def _tpu_sigmoid(x):
    # Mathematically exact: sigmoid(x) = 0.5 * tanh(0.5 * x) + 0.5.
    # tanh lowers to the EUP; avoids the multi-op f32 divide of stock sigmoid.
    return 0.5 * jnp.tanh(0.5 * x) + 0.5


def _make_kernel(activation):
    def kernel(w_ref, x_ref, o_ref):
        # w_ref: (3,) f32 in SMEM -> fc1.weight, fc2.weight, fc3.weight
        # x_ref / o_ref: (block_rows, _LANE_WIDTH) f32 tiles in VMEM
        x = x_ref[...]
        x = activation(x * w_ref[0])   # fc1 + activation
        x = activation(x * w_ref[1])   # fc2 + activation
        x = activation(x * w_ref[2])   # fc3 + activation
        o_ref[...] = x
    return kernel


@functools.partial(jax.jit, static_argnames=("activation",))
def simplenet_forward(x, weights, *, activation=_tpu_sigmoid):
    """x: (B, 1) float32; weights: (3,) float32 = [fc1.w, fc2.w, fc3.w]."""
    B, F = x.shape
    assert F == 1, "SimpleNet expects in_features == 1"

    n = B * F
    cols = _LANE_WIDTH
    padded = (n % cols) != 0

    if not padded:
        # ---- zero-copy fast path: reshape is a free bitcast ----
        rows = n // cols
        x_slab = jnp.reshape(x, (rows, cols))
    else:
        # ---- unaligned path: flatten, zero-pad one trailing partial row ----
        rows = pl.cdiv(n, cols)
        x_slab = jnp.pad(jnp.reshape(x, (-1,)),
                         (0, rows * cols - n)).reshape(rows, cols)

    # Block rows: multiple of the sublane (or the full extent), and >= 2 grid
    # steps whenever possible so v7x can shard the batch axis across both TCs.
    if rows > _TARGET_BLOCK_ROWS:
        block_rows = _TARGET_BLOCK_ROWS
    elif rows >= 2 * _SUBLANE:
        block_rows = _round_up(pl.cdiv(rows, 2), _SUBLANE)
    else:
        block_rows = rows          # block == full array extent (always legal)
    grid = (pl.cdiv(rows, block_rows),)   # last block may be a masked overhang

    kernel = _make_kernel(activation)
    # Alias only when x_slab is a fresh intermediate (pad path); on the
    # zero-copy path the slab is a view of a non-donated jit argument.
    aliases = {1: 0} if padded else {}

    out_slab = pl.pallas_call(
        kernel,
        out_shape=jax.ShapeDtypeStruct((rows, cols), x.dtype),
        grid=grid,
        in_specs=[
            pl.BlockSpec(memory_space=pltpu.MemorySpace.SMEM),      # weights
            pl.BlockSpec((block_rows, cols), lambda i: (i, 0)),     # x slab
        ],
        out_specs=pl.BlockSpec((block_rows, cols), lambda i: (i, 0)),
        input_output_aliases=aliases,
        compiler_params=pltpu.CompilerParams(
            dimension_semantics=("parallel",)),
        cost_estimate=pl.CostEstimate(
            flops=9 * rows * cols,
            transcendentals=3 * rows * cols,
            bytes_accessed=2 * 4 * rows * cols),
    )(weights, x_slab)

    # ---- back to the PyTorch (B, 1) convention ----
    if not padded:
        return out_slab.reshape(B, F)
    return out_slab.reshape(-1)[:n].reshape(B, F)


def simplenet_reference(x, weights):
    x = jax.nn.sigmoid(x * weights[0])
    x = jax.nn.sigmoid(x * weights[1])
    x = jax.nn.sigmoid(x * weights[2])
    return x


# TODO(synk): get_fc1_grad_abs_value() is a backward-pass/diagnostic hook with
# no forward-pass Pallas equivalent; not implemented here.

if __name__ == "__main__":
    key = jax.random.PRNGKey(0)

    # fc1/fc2/fc3 weights are all filled with 1.0 in the PyTorch __init__.
    weights = jnp.ones((3,), dtype=jnp.float32)

    # Small, module-consistent shape (B, 1) -- exercises the padded path.
    x_small = jax.random.normal(key, (8, 1), dtype=jnp.float32)
    out_small = jax.block_until_ready(simplenet_forward(x_small, weights))
    ref_small = simplenet_reference(x_small, weights)
    assert out_small.shape == (8, 1)
    assert jnp.allclose(out_small, ref_small, atol=1e-5, rtol=1e-5)

    # Lane-aligned batch -- exercises the zero-copy, multi-block path.
    x_big = jax.random.normal(key, (4096, 1), dtype=jnp.float32)
    out_big = jax.block_until_ready(simplenet_forward(x_big, weights))
    ref_big = simplenet_reference(x_big, weights)
    assert out_big.shape == (4096, 1)
    assert jnp.allclose(out_big, ref_big, atol=1e-5, rtol=1e-5)

    print("KERNEL_OK")
</pallas_src>

<mosaic_0001>
module attributes {stable_mosaic.version = 11 : i64} {
  func.func @kernel(%arg0: i32, %arg1: memref<3xf32, #tpu.memory_space<smem>>, %arg2: memref<1x128xf32, #tpu.memory_space<vmem>>, %arg3: memref<1x128xf32, #tpu.memory_space<vmem>>) attributes {dimension_semantics = [#tpu.dimension_semantics<parallel>], iteration_bounds = array<i64: 1>, scalar_prefetch = 0 : i64, scratch_operands = 0 : i64, tpu.core_type = #tpu.core_type<tc>, window_params = [{transform_indices = @transform_0, window_bounds = array<i64: 3>}, {transform_indices = @transform_1, window_bounds = array<i64: 1, 128>}, {transform_indices = @transform_2, window_bounds = array<i64: 1, 128>}]} {
    %c0 = arith.constant 0 : index
    %c0_0 = arith.constant 0 : index
    %0 = vector.load %arg2[%c0, %c0_0] : memref<1x128xf32, #tpu.memory_space<vmem>>, vector<1x128xf32>
    %c0_1 = arith.constant 0 : index
    %1 = memref.load %arg1[%c0_1] : memref<3xf32, #tpu.memory_space<smem>>
    %2 = vector.broadcast %1 : f32 to vector<1x128xf32>
    %3 = arith.mulf %0, %2 : vector<1x128xf32>
    %cst = arith.constant 5.000000e-01 : f32
    %4 = vector.broadcast %cst : f32 to vector<1x128xf32>
    %5 = arith.mulf %4, %3 : vector<1x128xf32>
    %6 = math.tanh %5 : vector<1x128xf32>
    %cst_2 = arith.constant 5.000000e-01 : f32
    %7 = vector.broadcast %cst_2 : f32 to vector<1x128xf32>
    %8 = arith.mulf %7, %6 : vector<1x128xf32>
    %cst_3 = arith.constant 5.000000e-01 : f32
    %9 = vector.broadcast %cst_3 : f32 to vector<1x128xf32>
    %10 = arith.addf %8, %9 : vector<1x128xf32>
    %c1 = arith.constant 1 : index
    %11 = memref.load %arg1[%c1] : memref<3xf32, #tpu.memory_space<smem>>
    %12 = vector.broadcast %11 : f32 to vector<1x128xf32>
    %13 = arith.mulf %10, %12 : vector<1x128xf32>
    %cst_4 = arith.constant 5.000000e-01 : f32
    %14 = vector.broadcast %cst_4 : f32 to vector<1x128xf32>
    %15 = arith.mulf %14, %13 : vector<1x128xf32>
    %16 = math.tanh %15 : vector<1x128xf32>
    %cst_5 = arith.constant 5.000000e-01 : f32
    %17 = vector.broadcast %cst_5 : f32 to vector<1x128xf32>
    %18 = arith.mulf %17, %16 : vector<1x128xf32>
    %cst_6 = arith.constant 5.000000e-01 : f32
    %19 = vector.broadcast %cst_6 : f32 to vector<1x128xf32>
    %20 = arith.addf %18, %19 : vector<1x128xf32>
    %c2 = arith.constant 2 : index
    %21 = memref.load %arg1[%c2] : memref<3xf32, #tpu.memory_space<smem>>
    %22 = vector.broadcast %21 : f32 to vector<1x128xf32>
    %23 = arith.mulf %20, %22 : vector<1x128xf32>
    %cst_7 = arith.constant 5.000000e-01 : f32
    %24 = vector.broadcast %cst_7 : f32 to vector<1x128xf32>
    %25 = arith.mulf %24, %23 : vector<1x128xf32>
    %26 = math.tanh %25 : vector<1x128xf32>
    %cst_8 = arith.constant 5.000000e-01 : f32
    %27 = vector.broadcast %cst_8 : f32 to vector<1x128xf32>
    %28 = arith.mulf %27, %26 : vector<1x128xf32>
    %cst_9 = arith.constant 5.000000e-01 : f32
    %29 = vector.broadcast %cst_9 : f32 to vector<1x128xf32>
    %30 = arith.addf %28, %29 : vector<1x128xf32>
    %c0_10 = arith.constant 0 : index
    %c0_11 = arith.constant 0 : index
    %31 = vector.load %arg3[%c0_10, %c0_11] : memref<1x128xf32, #tpu.memory_space<vmem>>, vector<1x128xf32>
    tpu.vector_store %arg3[%c0_10, %c0_11], %30 {strides = array<i32>} : memref<1x128xf32, #tpu.memory_space<vmem>>, vector<1x128xf32>,
    return
  }
  func.func @transform_0(%arg0: i32) -> i32 {
    %c0_i32 = arith.constant 0 : i32
    %c0_i32_0 = arith.constant 0 : i32
    return %c0_i32 : i32
  }
  func.func @transform_1(%arg0: i32) -> (i32, i32) {
    %c0_i32 = arith.constant 0 : i32
    %c0_i32_0 = arith.constant 0 : i32
    return %arg0, %c0_i32 : i32, i32
  }
  func.func @transform_2(%arg0: i32) -> (i32, i32) {
    %c0_i32 = arith.constant 0 : i32
    %c0_i32_0 = arith.constant 0 : i32
    return %arg0, %c0_i32 : i32, i32
  }
}

</mosaic_0001>

<bundles_post_ra>
// kernel: simplenet_forward.1
= control target key start
LH: loop header
LB: loop body
LE: loop exit
PB: predicated region body
PF: predicated region fallthrough
CT: control target
= control target key end

     0   :  { %7 = vsyncpa [#allocation3], 0  ;;  %s75_s12 = smov [#allocation2]   ;;  %s100_s0 = inlined_call_operand.vmem [shape: f32[3], index: 0, kind: input, shape index: {}]   ;;  %s101_s1 = inlined_call_operand.vmem [shape: f32[1,128], index: 1, kind: input, shape index: {}, may-alias: {1,2}]   ;;  %s102_s2 = inlined_call_operand.vmem [shape: f32[1,128], index: 2, kind: output, shape index: {}, may-alias: {1,2}]  }
   0x1   :  { %s13_s11 = sshll.u32 %s100_s0, 4  ;;  %s14_s11 = int_to_ptr.vmem [resolvable:$true] %s13_s11 }
   0x2   :  { %16 = dma.vmem_to_smem %s14_s11, 16, %s75_s12, [#allocation3]  }
   0x3   :  { %73 = dma.done.wait [#allocation3], 16  }
   0x4   :  { %74 = vsyncadd [#allocation3], 4294967280 }
   0x5   :  { %23 = sfence }
   0x6   :  { %s25_s13 = sld [smem:[#allocation2]]  ;;  %v24_v0 = vld [vmem:[%s101_s1] sm:$0x1] }
   0x7   :  { %s52_s16 = sld [smem:[#allocation2 + $0x1]] }
   0x8   :  { %s53_s0 = sld [smem:[#allocation2 + $0x2]] }
   0xc   :  { %v26_v1 = vstv %s25_s13 }
   0xd   :  { %v27_v2 = vmul.f32 %v26_v1, %v24_v0  ;;  %v33_v6 = vstv %s52_s16 }
   0xe   :  { %v40_v12 = vstv %s53_s0 }
   0xf   :  { %v28_v3 = vmul.f32 0.5, %v27_v2 }
  0x11   :  { %55 = vtanh.f32 %v28_v3 }
  0x17   :  { %v56_v4 = vpop.eup %55 }
  0x18   :  { %v30_v5 = vmul.f32 0.5, %v56_v4 }
  0x1a   :  { %v31_v7 = vadd.f32 0.5, %v30_v5 }
  0x1c   :  { %v34_v8 = vmul.f32 %v33_v6, %v31_v7 }
  0x1e   :  { %v35_v9 = vmul.f32 0.5, %v34_v8 }
  0x20   :  { %57 = vtanh.f32 %v35_v9 }
  0x26   :  { %v58_v10 = vpop.eup %57 }
  0x27   :  { %v37_v11 = vmul.f32 0.5, %v58_v10 }
  0x29   :  { %v38_v13 = vadd.f32 0.5, %v37_v11 }
  0x2b   :  { %v41_v14 = vmul.f32 %v40_v12, %v38_v13 }
  0x2d   :  { %v42_v15 = vmul.f32 0.5, %v41_v14 }
  0x2f   :  { %59 = vtanh.f32 %v42_v15 }
  0x35   :  { %v60_v16 = vpop.eup %59 }
  0x36   :  { %v44_v17 = vmul.f32 0.5, %v60_v16 }
  0x38   :  { %v45_v18 = vadd.f32 0.5, %v44_v17 }
  0x3a   :  { %46 = vst [vmem:[%s102_s2] sm:$0x1] %v45_v18 }
  0x3b   :  { %51 = vsyncpa [#allocation3], 1 }

</bundles_post_ra>
